<compile_context>
chip_gen: v7x
topology: tpu7x:2x2x1
jax: 0.10.0
libtpu: 0.0.40
codegen_flags: <defaults>
</compile_context>

<pallas_src>
import numpy as np
import jax
import jax.numpy as jnp
from jax.experimental import pallas as pl
from jax.experimental.pallas import tpu as pltpu


# ----------------------------- in-kernel helpers -----------------------------

def _layernorm(x, w, b, eps=1e-5):
    """PyTorch nn.LayerNorm semantics (biased variance, eps inside sqrt). f32."""
    mu = jnp.mean(x, axis=-1, keepdims=True)
    var = jnp.mean(jnp.square(x - mu), axis=-1, keepdims=True)
    return (x - mu) * jax.lax.rsqrt(var + eps) * w + b


# ----------------------------- Pallas kernels --------------------------------

def _block_kernel(x_ref, ln1w_ref, ln1b_ref,
                  wq_ref, bq_ref, wk_ref, bk_ref, wv_ref, bv_ref,
                  wo_ref, bo_ref, ln2w_ref, ln2b_ref,
                  w1_ref, b1_ref, w2_ref, b2_ref, o_ref):
    """One fused transformer Block for a single batch-row tile:
       x + attn(ln1(x)); then + mlp(ln2(x)).
       Weights arrive bf16 (VMEM-resident); matmuls are bf16 x bf16 -> f32."""
    x = x_ref[0]                                   # (T, C) f32
    T, C = x.shape
    H, _, D = wq_ref.shape
    scale = float(D) ** -0.5
    bf16 = jnp.bfloat16

    # --- attention branch (head-batched, no per-head Python loops) ---
    h1 = _layernorm(x, ln1w_ref[...], ln1b_ref[...])          # (T, C) f32
    h1b = jnp.broadcast_to(h1.astype(bf16), (H, T, C))        # leading-batch layout

    q = jnp.einsum('htc,hcd->htd', h1b, wq_ref[...],
                   preferred_element_type=jnp.float32) + bq_ref[...]
    k = jnp.einsum('htc,hcd->htd', h1b, wk_ref[...],
                   preferred_element_type=jnp.float32) + bk_ref[...]
    v = jnp.einsum('htc,hcd->htd', h1b, wv_ref[...],
                   preferred_element_type=jnp.float32) + bv_ref[...]

    # scores: one batched contraction over heads, contracting D (no explicit .T)
    s = jnp.einsum('htd,hsd->hts', q.astype(bf16), k.astype(bf16),
                   preferred_element_type=jnp.float32) * scale
    row = jax.lax.broadcasted_iota(jnp.int32, (T, T), 0)
    col = jax.lax.broadcasted_iota(jnp.int32, (T, T), 1)
    s = jnp.where((row >= col)[None, :, :], s, -jnp.inf)

    # softmax in f32; reciprocal goes to the (otherwise idle) EUP slot
    # TODO(synk): switch to flash-style kv-tiled online softmax for large T.
    s = s - jnp.max(s, axis=-1, keepdims=True)
    e = jnp.exp(s)
    p = e * pl.reciprocal(jnp.sum(e, axis=-1, keepdims=True), approx=True)

    o = jnp.einsum('hts,hsd->htd', p.astype(bf16), v.astype(bf16),
                   preferred_element_type=jnp.float32)         # (H, T, D)

    # out_proj folded per head: sum_h o[h] @ wo[h] -> lane-dense (T, C) slab
    partial = jnp.einsum('htd,hdc->htc', o.astype(bf16), wo_ref[...],
                         preferred_element_type=jnp.float32)
    x = x + jnp.sum(partial, axis=0) + bo_ref[...]

    # --- MLP branch (exact erf GELU in f32; dropout p=0 is a no-op) ---
    # TODO(synk): for C >= 1024 on v7x, K-tile these matmuls instead of keeping
    # full (C,4C)/(4C,C) weights resident.
    h2 = _layernorm(x, ln2w_ref[...], ln2b_ref[...])
    m = jnp.dot(h2.astype(bf16), w1_ref[...],
                preferred_element_type=jnp.float32) + b1_ref[...]
    m = 0.5 * m * (1.0 + jax.lax.erf(m * 0.7071067811865476))
    m = jnp.dot(m.astype(bf16), w2_ref[...],
                preferred_element_type=jnp.float32) + b2_ref[...]
    o_ref[0] = x + m


def _head_kernel(x_ref, lnw_ref, lnb_ref, w_ref, b_ref, o_ref):
    """Final LayerNorm + one (row tile, vocab tile) of the lm_head projection.
    (LayerNorm is recomputed per vocab tile; negligible vs the V-dim matmul.)"""
    h = _layernorm(x_ref[...], lnw_ref[...], lnb_ref[...])
    o_ref[...] = jnp.dot(h.astype(jnp.bfloat16), w_ref[...],
                         preferred_element_type=jnp.float32) + b_ref[...]


# ----------------------------- pallas_call wrappers ---------------------------

def _const_spec(shape):
    """Full-array block whose index never changes -> stays VMEM-resident."""
    nd = len(shape)
    return pl.BlockSpec(shape, lambda b, _z=(0,) * nd: _z)


def _row_tile(n):
    for t in (512, 256, 128, 64, 32, 16, 8):
        if t < n and n % t == 0:
            return t
    return n


def _vocab_tile(v):
    for t in (512, 256, 128):
        if v % t == 0:
            return t
    return v


def _block_forward(x, kp):
    B, T, C = x.shape
    weights = (kp['ln1_w'], kp['ln1_b'],
               kp['wq'], kp['bq'], kp['wk'], kp['bk'], kp['wv'], kp['bv'],
               kp['wo'], kp['bo'], kp['ln2_w'], kp['ln2_b'],
               kp['w1'], kp['b1'], kp['w2'], kp['b2'])
    act_spec = pl.BlockSpec((1, T, C), lambda b: (b, 0, 0))
    return pl.pallas_call(
        _block_kernel,
        out_shape=jax.ShapeDtypeStruct((B, T, C), jnp.float32),
        grid=(B,),
        in_specs=[act_spec] + [_const_spec(w.shape) for w in weights],
        out_specs=act_spec,
        compiler_params=pltpu.CompilerParams(
            dimension_semantics=("parallel",),          # use both TCs on v7x
            vmem_limit_bytes=48 * 1024 * 1024),
    )(x, *weights)


def _head_forward(x2, lnw, lnb, w, b):
    BT, C = x2.shape
    V = w.shape[1]
    tm = _row_tile(BT)
    tv = _vocab_tile(V)
    return pl.pallas_call(
        _head_kernel,
        out_shape=jax.ShapeDtypeStruct((BT, V), jnp.float32),
        grid=(BT // tm, V // tv),
        in_specs=[
            pl.BlockSpec((tm, C), lambda i, j: (i, 0)),
            pl.BlockSpec((1, C), lambda i, j: (0, 0)),
            pl.BlockSpec((1, C), lambda i, j: (0, 0)),
            pl.BlockSpec((C, tv), lambda i, j: (0, j)),   # stream head_w tiles
            pl.BlockSpec((1, tv), lambda i, j: (0, j)),
        ],
        out_specs=pl.BlockSpec((tm, tv), lambda i, j: (i, j)),
        compiler_params=pltpu.CompilerParams(
            dimension_semantics=("parallel", "parallel"),
            vmem_limit_bytes=48 * 1024 * 1024),
    )(x2, lnw, lnb, w, b)


# ----------------------------- parameters (PyTorch convention) ----------------

def init_params(key, vocab, embed, heads, seq_len, n_blocks):
    ks = iter(jax.random.split(key, 8 + 8 * n_blocks))
    nrm = lambda shape: 0.02 * jax.random.normal(next(ks), shape, jnp.float32)
    p = {
        'tok_emb': nrm((vocab, embed)),
        'pos_emb': nrm((seq_len, embed)),
        'lnf_w': jnp.ones((embed,), jnp.float32),
        'lnf_b': jnp.zeros((embed,), jnp.float32),
        'head_w': nrm((vocab, embed)),          # nn.Linear weight (out, in)
        'head_b': nrm((vocab,)),
        'blocks': [],
    }
    for _ in range(n_blocks):
        p['blocks'].append({
            'ln1_w': jnp.ones((embed,), jnp.float32),
            'ln1_b': jnp.zeros((embed,), jnp.float32),
            'ln2_w': jnp.ones((embed,), jnp.float32),
            'ln2_b': jnp.zeros((embed,), jnp.float32),
            'in_w': nrm((3 * embed, embed)),
            'in_b': nrm((3 * embed,)),
            'out_w': nrm((embed, embed)),
            'out_b': nrm((embed,)),
            'mlp1_w': nrm((4 * embed, embed)),
            'mlp1_b': nrm((4 * embed,)),
            'mlp2_w': nrm((embed, 4 * embed)),
            'mlp2_b': nrm((embed,)),
        })
    return p


def _block_kernel_params(bp, embed, heads):
    """Glue: reshape PyTorch-layout weights into the kernel's head-batched,
    lane-dense layouts and cast matmul weights to bf16."""
    C, H = embed, heads
    D = C // H
    n = np.arange(C)
    h, d = n // D, n % D
    # einops 'b t (d k h) -> k b h t d' with k=3: fastest axis h, then which(k),
    # then d; split order is q, v, k -> which = 0, 1, 2.
    rq = d * 3 * H + h
    rv = rq + H
    rk = rq + 2 * H
    bf16 = jnp.bfloat16
    wproj = lambda rows: bp['in_w'][rows].reshape(H, D, C).transpose(0, 2, 1).astype(bf16)
    bproj = lambda rows: bp['in_b'][rows].reshape(H, 1, D)
    r = lambda v: v[None, :]
    return {
        'ln1_w': r(bp['ln1_w']), 'ln1_b': r(bp['ln1_b']),
        'wq': wproj(rq), 'bq': bproj(rq),
        'wk': wproj(rk), 'bk': bproj(rk),
        'wv': wproj(rv), 'bv': bproj(rv),
        'wo': bp['out_w'].T.reshape(H, D, C).astype(bf16), 'bo': r(bp['out_b']),
        'ln2_w': r(bp['ln2_w']), 'ln2_b': r(bp['ln2_b']),
        'w1': bp['mlp1_w'].T.astype(bf16), 'b1': r(bp['mlp1_b']),
        'w2': bp['mlp2_w'].T.astype(bf16), 'b2': r(bp['mlp2_b']),
    }


# ----------------------------- full forward pass ------------------------------

def gpt_forward_pallas(idx, params, heads):
    B, T = idx.shape
    C = params['tok_emb'].shape[1]
    V = params['head_w'].shape[0]
    # Embedding lookup is an index gather -> plain-JAX glue (not a Pallas hot path).
    x = params['tok_emb'][idx] + params['pos_emb'][:T]
    # TODO(synk): cross-call prefetch of layer i+1 weights during layer i compute.
    for bp in params['blocks']:
        x = _block_forward(x, _block_kernel_params(bp, C, heads))
    logits = _head_forward(x.reshape(B * T, C),
                           params['lnf_w'][None, :], params['lnf_b'][None, :],
                           params['head_w'].T.astype(jnp.bfloat16),
                           params['head_b'][None, :])
    return logits.reshape(B, T, V)


def gpt_forward_ref(idx, params, heads):
    """Pure-JAX (f32) literal transcription of the PyTorch module, for verification."""
    B, T = idx.shape
    C = params['tok_emb'].shape[1]
    H = heads
    D = C // H
    x = params['tok_emb'][idx] + params['pos_emb'][:T]
    for bp in params['blocks']:
        h1 = _layernorm(x, bp['ln1_w'], bp['ln1_b'])
        qvk = h1 @ bp['in_w'].T + bp['in_b']
        qvk = jnp.transpose(qvk.reshape(B, T, D, 3, H), (3, 0, 4, 1, 2))
        q, v, k = qvk[0], qvk[1], qvk[2]          # NOTE: q, v, k order (as in torch code)
        s = jnp.einsum('bhid,bhjd->bhij', q, k) * D ** (-0.5)
        mask = jnp.tril(jnp.ones((T, T), jnp.float32))
        s = jnp.where(mask == 0, -jnp.inf, s)
        a = jax.nn.softmax(s, axis=-1)
        out = jnp.einsum('bhij,bhjd->bhid', a, v)
        out = jnp.transpose(out, (0, 2, 1, 3)).reshape(B, T, C)
        x = x + out @ bp['out_w'].T + bp['out_b']
        h2 = _layernorm(x, bp['ln2_w'], bp['ln2_b'])
        m = jax.nn.gelu(h2 @ bp['mlp1_w'].T + bp['mlp1_b'], approximate=False)
        x = x + m @ bp['mlp2_w'].T + bp['mlp2_b']
    x = _layernorm(x, params['lnf_w'], params['lnf_b'])
    return x @ params['head_w'].T + params['head_b']


# ----------------------------- main -------------------------------------------

if __name__ == "__main__":
    # TODO(synk): GPT.generate() (multinomial sampling loop) is host-side control
    # flow and is not implemented as a kernel.
    VOCAB, EMBED, HEADS, SEQ, NBLOCKS = 64, 32, 4, 8, 2
    BATCH = 2

    params = init_params(jax.random.PRNGKey(0), VOCAB, EMBED, HEADS, SEQ, NBLOCKS)
    idx = jax.random.randint(jax.random.PRNGKey(1), (BATCH, SEQ), 0, VOCAB,
                             dtype=jnp.int32)

    logits = gpt_forward_pallas(idx, params, HEADS)
    logits = jax.block_until_ready(logits)
    assert logits.shape == (BATCH, SEQ, VOCAB)

    ref = gpt_forward_ref(idx, params, HEADS)
    if not np.allclose(np.asarray(logits), np.asarray(ref), atol=5e-2, rtol=5e-2):
        raise AssertionError("Pallas GPT forward does not match JAX reference")

    print("KERNEL_OK")
</pallas_src>

<mosaic_0001>
module attributes {stable_mosaic.version = 11 : i64} {
  func.func @_block_kernel(%arg0: i32, %arg1: memref<1x8x32xf32, #tpu.memory_space<vmem>>, %arg2: memref<1x32xf32, #tpu.memory_space<vmem>>, %arg3: memref<1x32xf32, #tpu.memory_space<vmem>>, %arg4: memref<4x32x8xbf16, #tpu.memory_space<vmem>>, %arg5: memref<4x1x8xf32, #tpu.memory_space<vmem>>, %arg6: memref<4x32x8xbf16, #tpu.memory_space<vmem>>, %arg7: memref<4x1x8xf32, #tpu.memory_space<vmem>>, %arg8: memref<4x32x8xbf16, #tpu.memory_space<vmem>>, %arg9: memref<4x1x8xf32, #tpu.memory_space<vmem>>, %arg10: memref<4x8x32xbf16, #tpu.memory_space<vmem>>, %arg11: memref<1x32xf32, #tpu.memory_space<vmem>>, %arg12: memref<1x32xf32, #tpu.memory_space<vmem>>, %arg13: memref<1x32xf32, #tpu.memory_space<vmem>>, %arg14: memref<32x128xbf16, #tpu.memory_space<vmem>>, %arg15: memref<1x128xf32, #tpu.memory_space<vmem>>, %arg16: memref<128x32xbf16, #tpu.memory_space<vmem>>, %arg17: memref<1x32xf32, #tpu.memory_space<vmem>>, %arg18: memref<1x8x32xf32, #tpu.memory_space<vmem>>) attributes {dimension_semantics = [#tpu.dimension_semantics<parallel>], iteration_bounds = array<i64: 2>, scalar_prefetch = 0 : i64, scratch_operands = 0 : i64, tpu.core_type = #tpu.core_type<tc>, window_params = [{transform_indices = @transform_0, window_bounds = array<i64: 1, 8, 32>}, {pipeline_mode = #tpu.pipeline_mode<synchronous>, transform_indices = @transform_1, window_bounds = array<i64: 1, 32>}, {pipeline_mode = #tpu.pipeline_mode<synchronous>, transform_indices = @transform_2, window_bounds = array<i64: 1, 32>}, {pipeline_mode = #tpu.pipeline_mode<synchronous>, transform_indices = @transform_3, window_bounds = array<i64: 4, 32, 8>}, {pipeline_mode = #tpu.pipeline_mode<synchronous>, transform_indices = @transform_4, window_bounds = array<i64: 4, 1, 8>}, {pipeline_mode = #tpu.pipeline_mode<synchronous>, transform_indices = @transform_5, window_bounds = array<i64: 4, 32, 8>}, {pipeline_mode = #tpu.pipeline_mode<synchronous>, transform_indices = @transform_6, window_bounds = array<i64: 4, 1, 8>}, {pipeline_mode = #tpu.pipeline_mode<synchronous>, transform_indices = @transform_7, window_bounds = array<i64: 4, 32, 8>}, {pipeline_mode = #tpu.pipeline_mode<synchronous>, transform_indices = @transform_8, window_bounds = array<i64: 4, 1, 8>}, {pipeline_mode = #tpu.pipeline_mode<synchronous>, transform_indices = @transform_9, window_bounds = array<i64: 4, 8, 32>}, {pipeline_mode = #tpu.pipeline_mode<synchronous>, transform_indices = @transform_10, window_bounds = array<i64: 1, 32>}, {pipeline_mode = #tpu.pipeline_mode<synchronous>, transform_indices = @transform_11, window_bounds = array<i64: 1, 32>}, {pipeline_mode = #tpu.pipeline_mode<synchronous>, transform_indices = @transform_12, window_bounds = array<i64: 1, 32>}, {pipeline_mode = #tpu.pipeline_mode<synchronous>, transform_indices = @transform_13, window_bounds = array<i64: 32, 128>}, {pipeline_mode = #tpu.pipeline_mode<synchronous>, transform_indices = @transform_14, window_bounds = array<i64: 1, 128>}, {pipeline_mode = #tpu.pipeline_mode<synchronous>, transform_indices = @transform_15, window_bounds = array<i64: 128, 32>}, {pipeline_mode = #tpu.pipeline_mode<synchronous>, transform_indices = @transform_16, window_bounds = array<i64: 1, 32>}, {transform_indices = @transform_17, window_bounds = array<i64: 1, 8, 32>}]} {
    %c0 = arith.constant 0 : index
    %c0_0 = arith.constant 0 : index
    %c0_1 = arith.constant 0 : index
    %0 = vector.load %arg1[%c0, %c0_0, %c0_1] : memref<1x8x32xf32, #tpu.memory_space<vmem>>, vector<1x8x32xf32>
    %1 = vector.shape_cast %0 : vector<1x8x32xf32> to vector<8x32xf32>
    %c0_2 = arith.constant 0 : index
    %c0_3 = arith.constant 0 : index
    %2 = vector.load %arg2[%c0_2, %c0_3] : memref<1x32xf32, #tpu.memory_space<vmem>>, vector<1x32xf32>
    %c0_4 = arith.constant 0 : index
    %c0_5 = arith.constant 0 : index
    %3 = vector.load %arg3[%c0_4, %c0_5] : memref<1x32xf32, #tpu.memory_space<vmem>>, vector<1x32xf32>
    %cst = arith.constant dense<0.000000e+00> : vector<8xf32>
    %4 = vector.multi_reduction <add>, %1, %cst [1] : vector<8x32xf32> to vector<8xf32>
    %5 = vector.shape_cast %4 : vector<8xf32> to vector<8x1xf32>
    %cst_6 = arith.constant 3.200000e+01 : f32
    %6 = vector.broadcast %cst_6 : f32 to vector<8x1xf32>
    %7 = arith.divf %5, %6 : vector<8x1xf32>
    %8 = vector.broadcast %7 : vector<8x1xf32> to vector<8x32xf32>
    %9 = arith.subf %1, %8 : vector<8x32xf32>
    %10 = arith.mulf %9, %9 : vector<8x32xf32>
    %cst_7 = arith.constant dense<0.000000e+00> : vector<8xf32>
    %11 = vector.multi_reduction <add>, %10, %cst_7 [1] : vector<8x32xf32> to vector<8xf32>
    %12 = vector.shape_cast %11 : vector<8xf32> to vector<8x1xf32>
    %cst_8 = arith.constant 3.200000e+01 : f32
    %13 = vector.broadcast %cst_8 : f32 to vector<8x1xf32>
    %14 = arith.divf %12, %13 : vector<8x1xf32>
    %15 = vector.broadcast %7 : vector<8x1xf32> to vector<8x32xf32>
    %16 = arith.subf %1, %15 : vector<8x32xf32>
    %cst_9 = arith.constant 9.99999974E-6 : f32
    %17 = vector.broadcast %cst_9 : f32 to vector<8x1xf32>
    %18 = arith.addf %14, %17 : vector<8x1xf32>
    %19 = math.rsqrt %18 : vector<8x1xf32>
    %20 = vector.broadcast %19 : vector<8x1xf32> to vector<8x32xf32>
    %21 = arith.mulf %16, %20 : vector<8x32xf32>
    %22 = vector.broadcast %2 : vector<1x32xf32> to vector<8x32xf32>
    %23 = arith.mulf %21, %22 : vector<8x32xf32>
    %24 = vector.broadcast %3 : vector<1x32xf32> to vector<8x32xf32>
    %25 = arith.addf %23, %24 : vector<8x32xf32>
    %26 = arith.truncf %25 : vector<8x32xf32> to vector<8x32xbf16>
    %27 = vector.shape_cast %26 : vector<8x32xbf16> to vector<1x8x32xbf16>
    %28 = vector.broadcast %27 : vector<1x8x32xbf16> to vector<4x8x32xbf16>
    %c0_10 = arith.constant 0 : index
    %c0_11 = arith.constant 0 : index
    %c0_12 = arith.constant 0 : index
    %29 = vector.load %arg4[%c0_10, %c0_11, %c0_12] : memref<4x32x8xbf16, #tpu.memory_space<vmem>>, vector<4x32x8xbf16>
    "tpu.trace_start"() <{level = 10 : i32, message = "htc,hcd->htd"}> : () -> ()
    %cst_13 = arith.constant dense<0.000000e+00> : vector<4x8x8xf32>
    %30 = tpu.matmul %28, %29, %cst_13 {dimension_numbers = #tpu.dot_dimension_numbers<[2], [1], [1], [2], [0, 0, 0, 1, 1, 2], [0], [0]>} : vector<4x8x32xbf16>, vector<4x32x8xbf16>, vector<4x8x8xf32> -> vector<4x8x8xf32>
    "tpu.trace_stop"() : () -> ()
    %c0_14 = arith.constant 0 : index
    %c0_15 = arith.constant 0 : index
    %c0_16 = arith.constant 0 : index
    %31 = vector.load %arg5[%c0_14, %c0_15, %c0_16] : memref<4x1x8xf32, #tpu.memory_space<vmem>>, vector<4x1x8xf32>
    %32 = vector.broadcast %31 : vector<4x1x8xf32> to vector<4x8x8xf32>
    %33 = arith.addf %30, %32 : vector<4x8x8xf32>
    %c0_17 = arith.constant 0 : index
    %c0_18 = arith.constant 0 : index
    %c0_19 = arith.constant 0 : index
    %34 = vector.load %arg6[%c0_17, %c0_18, %c0_19] : memref<4x32x8xbf16, #tpu.memory_space<vmem>>, vector<4x32x8xbf16>
    "tpu.trace_start"() <{level = 10 : i32, message = "htc,hcd->htd"}> : () -> ()
    %cst_20 = arith.constant dense<0.000000e+00> : vector<4x8x8xf32>
    %35 = tpu.matmul %28, %34, %cst_20 {dimension_numbers = #tpu.dot_dimension_numbers<[2], [1], [1], [2], [0, 0, 0, 1, 1, 2], [0], [0]>} : vector<4x8x32xbf16>, vector<4x32x8xbf16>, vector<4x8x8xf32> -> vector<4x8x8xf32>
    "tpu.trace_stop"() : () -> ()
    %c0_21 = arith.constant 0 : index
    %c0_22 = arith.constant 0 : index
    %c0_23 = arith.constant 0 : index
    %36 = vector.load %arg7[%c0_21, %c0_22, %c0_23] : memref<4x1x8xf32, #tpu.memory_space<vmem>>, vector<4x1x8xf32>
    %37 = vector.broadcast %36 : vector<4x1x8xf32> to vector<4x8x8xf32>
    %38 = arith.addf %35, %37 : vector<4x8x8xf32>
    %c0_24 = arith.constant 0 : index
    %c0_25 = arith.constant 0 : index
    %c0_26 = arith.constant 0 : index
    %39 = vector.load %arg8[%c0_24, %c0_25, %c0_26] : memref<4x32x8xbf16, #tpu.memory_space<vmem>>, vector<4x32x8xbf16>
    "tpu.trace_start"() <{level = 10 : i32, message = "htc,hcd->htd"}> : () -> ()
    %cst_27 = arith.constant dense<0.000000e+00> : vector<4x8x8xf32>
    %40 = tpu.matmul %28, %39, %cst_27 {dimension_numbers = #tpu.dot_dimension_numbers<[2], [1], [1], [2], [0, 0, 0, 1, 1, 2], [0], [0]>} : vector<4x8x32xbf16>, vector<4x32x8xbf16>, vector<4x8x8xf32> -> vector<4x8x8xf32>
    "tpu.trace_stop"() : () -> ()
    %c0_28 = arith.constant 0 : index
    %c0_29 = arith.constant 0 : index
    %c0_30 = arith.constant 0 : index
    %41 = vector.load %arg9[%c0_28, %c0_29, %c0_30] : memref<4x1x8xf32, #tpu.memory_space<vmem>>, vector<4x1x8xf32>
    %42 = vector.broadcast %41 : vector<4x1x8xf32> to vector<4x8x8xf32>
    %43 = arith.addf %40, %42 : vector<4x8x8xf32>
    %44 = arith.truncf %33 : vector<4x8x8xf32> to vector<4x8x8xbf16>
    %45 = arith.truncf %38 : vector<4x8x8xf32> to vector<4x8x8xbf16>
    "tpu.trace_start"() <{level = 10 : i32, message = "htd,hsd->hts"}> : () -> ()
    %cst_31 = arith.constant dense<0.000000e+00> : vector<4x8x8xf32>
    %46 = tpu.matmul %44, %45, %cst_31 {dimension_numbers = #tpu.dot_dimension_numbers<[2], [2], [1], [1], [0, 0, 0, 1, 1, 1], [0], [0]>} : vector<4x8x8xbf16>, vector<4x8x8xbf16>, vector<4x8x8xf32> -> vector<4x8x8xf32>
    "tpu.trace_stop"() : () -> ()
    %cst_32 = arith.constant 0.353553385 : f32
    %47 = vector.broadcast %cst_32 : f32 to vector<4x8x8xf32>
    %48 = arith.mulf %46, %47 : vector<4x8x8xf32>
    %49 = tpu.iota {dimensions = array<i32: 0>} : vector<8x8xi32>
    %50 = tpu.iota {dimensions = array<i32: 1>} : vector<8x8xi32>
    %51 = arith.cmpi sge, %49, %50 : vector<8x8xi32>
    %52 = vector.shape_cast %51 : vector<8x8xi1> to vector<1x8x8xi1>
    %cst_33 = arith.constant 0xFF800000 : f32
    %53 = vector.shape_cast %52 : vector<1x8x8xi1> to vector<1x8x8xi1>
    %54 = vector.broadcast %53 : vector<1x8x8xi1> to vector<4x8x8xi1>
    %55 = vector.broadcast %cst_33 : f32 to vector<4x8x8xf32>
    %56 = arith.select %54, %48, %55 : vector<4x8x8xi1>, vector<4x8x8xf32>
    %cst_34 = arith.constant dense<0xFF800000> : vector<4x8xf32>
    %57 = vector.multi_reduction <maximumf>, %56, %cst_34 [2] : vector<4x8x8xf32> to vector<4x8xf32>
    %58 = vector.shape_cast %57 : vector<4x8xf32> to vector<4x8x1xf32>
    %59 = vector.broadcast %58 : vector<4x8x1xf32> to vector<4x8x8xf32>
    %60 = arith.subf %56, %59 : vector<4x8x8xf32>
    %61 = math.exp %60 : vector<4x8x8xf32>
    %cst_35 = arith.constant dense<0.000000e+00> : vector<4x8xf32>
    %62 = vector.multi_reduction <add>, %61, %cst_35 [2] : vector<4x8x8xf32> to vector<4x8xf32>
    %63 = vector.shape_cast %62 : vector<4x8xf32> to vector<4x8x1xf32>
    %64 = tpu.reciprocal %63 {approx = true} : vector<4x8x1xf32> -> vector<4x8x1xf32>
    %65 = vector.broadcast %64 : vector<4x8x1xf32> to vector<4x8x8xf32>
    %66 = arith.mulf %61, %65 : vector<4x8x8xf32>
    %67 = arith.truncf %66 : vector<4x8x8xf32> to vector<4x8x8xbf16>
    %68 = arith.truncf %43 : vector<4x8x8xf32> to vector<4x8x8xbf16>
    "tpu.trace_start"() <{level = 10 : i32, message = "hts,hsd->htd"}> : () -> ()
    %cst_36 = arith.constant dense<0.000000e+00> : vector<4x8x8xf32>
    %69 = tpu.matmul %67, %68, %cst_36 {dimension_numbers = #tpu.dot_dimension_numbers<[2], [1], [1], [2], [0, 0, 0, 1, 1, 2], [0], [0]>} : vector<4x8x8xbf16>, vector<4x8x8xbf16>, vector<4x8x8xf32> -> vector<4x8x8xf32>
    "tpu.trace_stop"() : () -> ()
    %70 = arith.truncf %69 : vector<4x8x8xf32> to vector<4x8x8xbf16>
    %c0_37 = arith.constant 0 : index
    %c0_38 = arith.constant 0 : index
    %c0_39 = arith.constant 0 : index
    %71 = vector.load %arg10[%c0_37, %c0_38, %c0_39] : memref<4x8x32xbf16, #tpu.memory_space<vmem>>, vector<4x8x32xbf16>
    "tpu.trace_start"() <{level = 10 : i32, message = "htd,hdc->htc"}> : () -> ()
    %cst_40 = arith.constant dense<0.000000e+00> : vector<4x8x32xf32>
    %72 = tpu.matmul %70, %71, %cst_40 {dimension_numbers = #tpu.dot_dimension_numbers<[2], [1], [1], [2], [0, 0, 0, 1, 1, 2], [0], [0]>} : vector<4x8x8xbf16>, vector<4x8x32xbf16>, vector<4x8x32xf32> -> vector<4x8x32xf32>
    "tpu.trace_stop"() : () -> ()
    %cst_41 = arith.constant dense<0.000000e+00> : vector<8x32xf32>
    %73 = vector.multi_reduction <add>, %72, %cst_41 [0] : vector<4x8x32xf32> to vector<8x32xf32>
    %74 = arith.addf %1, %73 : vector<8x32xf32>
    %c0_42 = arith.constant 0 : index
    %c0_43 = arith.constant 0 : index
    %75 = vector.load %arg11[%c0_42, %c0_43] : memref<1x32xf32, #tpu.memory_space<vmem>>, vector<1x32xf32>
    %76 = vector.broadcast %75 : vector<1x32xf32> to vector<8x32xf32>
    %77 = arith.addf %74, %76 : vector<8x32xf32>
    %c0_44 = arith.constant 0 : index
    %c0_45 = arith.constant 0 : index
    %78 = vector.load %arg12[%c0_44, %c0_45] : memref<1x32xf32, #tpu.memory_space<vmem>>, vector<1x32xf32>
    %c0_46 = arith.constant 0 : index
    %c0_47 = arith.constant 0 : index
    %79 = vector.load %arg13[%c0_46, %c0_47] : memref<1x32xf32, #tpu.memory_space<vmem>>, vector<1x32xf32>
    %cst_48 = arith.constant dense<0.000000e+00> : vector<8xf32>
    %80 = vector.multi_reduction <add>, %77, %cst_48 [1] : vector<8x32xf32> to vector<8xf32>
    %81 = vector.shape_cast %80 : vector<8xf32> to vector<8x1xf32>
    %cst_49 = arith.constant 3.200000e+01 : f32
    %82 = vector.broadcast %cst_49 : f32 to vector<8x1xf32>
    %83 = arith.divf %81, %82 : vector<8x1xf32>
    %84 = vector.broadcast %83 : vector<8x1xf32> to vector<8x32xf32>
    %85 = arith.subf %77, %84 : vector<8x32xf32>
    %86 = arith.mulf %85, %85 : vector<8x32xf32>
    %cst_50 = arith.constant dense<0.000000e+00> : vector<8xf32>
    %87 = vector.multi_reduction <add>, %86, %cst_50 [1] : vector<8x32xf32> to vector<8xf32>
    %88 = vector.shape_cast %87 : vector<8xf32> to vector<8x1xf32>
    %cst_51 = arith.constant 3.200000e+01 : f32
    %89 = vector.broadcast %cst_51 : f32 to vector<8x1xf32>
    %90 = arith.divf %88, %89 : vector<8x1xf32>
    %91 = vector.broadcast %83 : vector<8x1xf32> to vector<8x32xf32>
    %92 = arith.subf %77, %91 : vector<8x32xf32>
    %cst_52 = arith.constant 9.99999974E-6 : f32
    %93 = vector.broadcast %cst_52 : f32 to vector<8x1xf32>
    %94 = arith.addf %90, %93 : vector<8x1xf32>
    %95 = math.rsqrt %94 : vector<8x1xf32>
    %96 = vector.broadcast %95 : vector<8x1xf32> to vector<8x32xf32>
    %97 = arith.mulf %92, %96 : vector<8x32xf32>
    %98 = vector.broadcast %78 : vector<1x32xf32> to vector<8x32xf32>
    %99 = arith.mulf %97, %98 : vector<8x32xf32>
    %100 = vector.broadcast %79 : vector<1x32xf32> to vector<8x32xf32>
    %101 = arith.addf %99, %100 : vector<8x32xf32>
    %102 = arith.truncf %101 : vector<8x32xf32> to vector<8x32xbf16>
    %c0_53 = arith.constant 0 : index
    %c0_54 = arith.constant 0 : index
    %103 = vector.load %arg14[%c0_53, %c0_54] : memref<32x128xbf16, #tpu.memory_space<vmem>>, vector<32x128xbf16>
    %cst_55 = arith.constant dense<0.000000e+00> : vector<8x128xf32>
    %104 = tpu.matmul %102, %103, %cst_55 {dimension_numbers = #tpu.dot_dimension_numbers<[1], [0], [0], [1], [0, 0, 1, 1], [], []>} : vector<8x32xbf16>, vector<32x128xbf16>, vector<8x128xf32> -> vector<8x128xf32>
    %c0_56 = arith.constant 0 : index
    %c0_57 = arith.constant 0 : index
    %105 = vector.load %arg15[%c0_56, %c0_57] : memref<1x128xf32, #tpu.memory_space<vmem>>, vector<1x128xf32>
    %106 = vector.broadcast %105 : vector<1x128xf32> to vector<8x128xf32>
    %107 = arith.addf %104, %106 : vector<8x128xf32>
    %cst_58 = arith.constant 5.000000e-01 : f32
    %108 = vector.broadcast %cst_58 : f32 to vector<8x128xf32>
    %109 = arith.mulf %108, %107 : vector<8x128xf32>
    %cst_59 = arith.constant 0.707106769 : f32
    %110 = vector.broadcast %cst_59 : f32 to vector<8x128xf32>
    %111 = arith.mulf %107, %110 : vector<8x128xf32>
    %112 = math.erf %111 : vector<8x128xf32>
    %cst_60 = arith.constant 1.000000e+00 : f32
    %113 = vector.broadcast %cst_60 : f32 to vector<8x128xf32>
    %114 = arith.addf %113, %112 : vector<8x128xf32>
    %115 = arith.mulf %109, %114 : vector<8x128xf32>
    %116 = arith.truncf %115 : vector<8x128xf32> to vector<8x128xbf16>
    %c0_61 = arith.constant 0 : index
    %c0_62 = arith.constant 0 : index
    %117 = vector.load %arg16[%c0_61, %c0_62] : memref<128x32xbf16, #tpu.memory_space<vmem>>, vector<128x32xbf16>
    %cst_63 = arith.constant dense<0.000000e+00> : vector<8x32xf32>
    %118 = tpu.matmul %116, %117, %cst_63 {dimension_numbers = #tpu.dot_dimension_numbers<[1], [0], [0], [1], [0, 0, 1, 1], [], []>} : vector<8x128xbf16>, vector<128x32xbf16>, vector<8x32xf32> -> vector<8x32xf32>
    %c0_64 = arith.constant 0 : index
    %c0_65 = arith.constant 0 : index
    %119 = vector.load %arg17[%c0_64, %c0_65] : memref<1x32xf32, #tpu.memory_space<vmem>>, vector<1x32xf32>
    %120 = vector.broadcast %119 : vector<1x32xf32> to vector<8x32xf32>
    %121 = arith.addf %118, %120 : vector<8x32xf32>
    %122 = arith.addf %77, %121 : vector<8x32xf32>
    %c0_66 = arith.constant 0 : index
    %c0_67 = arith.constant 0 : index
    %c0_68 = arith.constant 0 : index
    %123 = vector.load %arg18[%c0_66, %c0_67, %c0_68] : memref<1x8x32xf32, #tpu.memory_space<vmem>>, vector<1x8x32xf32>
    %124 = vector.shape_cast %123 : vector<1x8x32xf32> to vector<8x32xf32>
    %125 = vector.shape_cast %122 : vector<8x32xf32> to vector<1x8x32xf32>
    tpu.vector_store %arg18[%c0_66, %c0_67, %c0_68], %125 {strides = array<i32>} : memref<1x8x32xf32, #tpu.memory_space<vmem>>, vector<1x8x32xf32>,
    return
  }
  func.func @transform_0(%arg0: i32) -> (i32, i32, i32) {
    %c0_i32 = arith.constant 0 : i32
    %c0_i32_0 = arith.constant 0 : i32
    %c0_i32_1 = arith.constant 0 : i32
    return %arg0, %c0_i32, %c0_i32_0 : i32, i32, i32
  }
  func.func @transform_1(%arg0: i32) -> (i32, i32) {
    %c0_i32 = arith.constant 0 : i32
    %c0_i32_0 = arith.constant 0 : i32
    %c0_i32_1 = arith.constant 0 : i32
    return %c0_i32, %c0_i32_0 : i32, i32
  }
  func.func @transform_2(%arg0: i32) -> (i32, i32) {
    %c0_i32 = arith.constant 0 : i32
    %c0_i32_0 = arith.constant 0 : i32
    %c0_i32_1 = arith.constant 0 : i32
    return %c0_i32, %c0_i32_0 : i32, i32
  }
  func.func @transform_3(%arg0: i32) -> (i32, i32, i32) {
    %c0_i32 = arith.constant 0 : i32
    %c0_i32_0 = arith.constant 0 : i32
    %c0_i32_1 = arith.constant 0 : i32
    %c0_i32_2 = arith.constant 0 : i32
    return %c0_i32, %c0_i32_0, %c0_i32_1 : i32, i32, i32
  }
  func.func @transform_4(%arg0: i32) -> (i32, i32, i32) {
    %c0_i32 = arith.constant 0 : i32
    %c0_i32_0 = arith.constant 0 : i32
    %c0_i32_1 = arith.constant 0 : i32
    %c0_i32_2 = arith.constant 0 : i32
    return %c0_i32, %c0_i32_0, %c0_i32_1 : i32, i32, i32
  }
  func.func @transform_5(%arg0: i32) -> (i32, i32, i32) {
    %c0_i32 = arith.constant 0 : i32
    %c0_i32_0 = arith.constant 0 : i32
    %c0_i32_1 = arith.constant 0 : i32
    %c0_i32_2 = arith.constant 0 : i32
    return %c0_i32, %c0_i32_0, %c0_i32_1 : i32, i32, i32
  }
  func.func @transform_6(%arg0: i32) -> (i32, i32, i32) {
    %c0_i32 = arith.constant 0 : i32
    %c0_i32_0 = arith.constant 0 : i32
    %c0_i32_1 = arith.constant 0 : i32
    %c0_i32_2 = arith.constant 0 : i32
    return %c0_i32, %c0_i32_0, %c0_i32_1 : i32, i32, i32
  }
  func.func @transform_7(%arg0: i32) -> (i32, i32, i32) {
    %c0_i32 = arith.constant 0 : i32
    %c0_i32_0 = arith.constant 0 : i32
    %c0_i32_1 = arith.constant 0 : i32
    %c0_i32_2 = arith.constant 0 : i32
    return %c0_i32, %c0_i32_0, %c0_i32_1 : i32, i32, i32
  }
  func.func @transform_8(%arg0: i32) -> (i32, i32, i32) {
    %c0_i32 = arith.constant 0 : i32
    %c0_i32_0 = arith.constant 0 : i32
    %c0_i32_1 = arith.constant 0 : i32
    %c0_i32_2 = arith.constant 0 : i32
    return %c0_i32, %c0_i32_0, %c0_i32_1 : i32, i32, i32
  }
  func.func @transform_9(%arg0: i32) -> (i32, i32, i32) {
    %c0_i32 = arith.constant 0 : i32
    %c0_i32_0 = arith.constant 0 : i32
    %c0_i32_1 = arith.constant 0 : i32
    %c0_i32_2 = arith.constant 0 : i32
    return %c0_i32, %c0_i32_0, %c0_i32_1 : i32, i32, i32
  }
  func.func @transform_10(%arg0: i32) -> (i32, i32) {
    %c0_i32 = arith.constant 0 : i32
    %c0_i32_0 = arith.constant 0 : i32
    %c0_i32_1 = arith.constant 0 : i32
    return %c0_i32, %c0_i32_0 : i32, i32
  }
  func.func @transform_11(%arg0: i32) -> (i32, i32) {
    %c0_i32 = arith.constant 0 : i32
    %c0_i32_0 = arith.constant 0 : i32
    %c0_i32_1 = arith.constant 0 : i32
    return %c0_i32, %c0_i32_0 : i32, i32
  }
  func.func @transform_12(%arg0: i32) -> (i32, i32) {
    %c0_i32 = arith.constant 0 : i32
    %c0_i32_0 = arith.constant 0 : i32
    %c0_i32_1 = arith.constant 0 : i32
    return %c0_i32, %c0_i32_0 : i32, i32
  }
  func.func @transform_13(%arg0: i32) -> (i32, i32) {
    %c0_i32 = arith.constant 0 : i32
    %c0_i32_0 = arith.constant 0 : i32
    %c0_i32_1 = arith.constant 0 : i32
    return %c0_i32, %c0_i32_0 : i32, i32
  }
  func.func @transform_14(%arg0: i32) -> (i32, i32) {
    %c0_i32 = arith.constant 0 : i32
    %c0_i32_0 = arith.constant 0 : i32
    %c0_i32_1 = arith.constant 0 : i32
    return %c0_i32, %c0_i32_0 : i32, i32
  }
  func.func @transform_15(%arg0: i32) -> (i32, i32) {
    %c0_i32 = arith.constant 0 : i32
    %c0_i32_0 = arith.constant 0 : i32
    %c0_i32_1 = arith.constant 0 : i32
    return %c0_i32, %c0_i32_0 : i32, i32
  }
  func.func @transform_16(%arg0: i32) -> (i32, i32) {
    %c0_i32 = arith.constant 0 : i32
    %c0_i32_0 = arith.constant 0 : i32
    %c0_i32_1 = arith.constant 0 : i32
    return %c0_i32, %c0_i32_0 : i32, i32
  }
  func.func @transform_17(%arg0: i32) -> (i32, i32, i32) {
    %c0_i32 = arith.constant 0 : i32
    %c0_i32_0 = arith.constant 0 : i32
    %c0_i32_1 = arith.constant 0 : i32
    return %arg0, %c0_i32, %c0_i32_0 : i32, i32, i32
  }
}

</mosaic_0001>

<bundles_post_ra>
// kernel: tpu_custom_call.1
= control target key start
LH: loop header
LB: loop body
LE: loop exit
PB: predicated region body
PF: predicated region fallthrough
CT: control target
= control target key end

     0   :  { %s3344_s0 = inlined_call_operand.vmem [shape: f32[2,8,32], index: 0, kind: input, shape index: {}]   ;;  %s3345_s1 = inlined_call_operand.vmem [shape: f32[1,32], index: 1, kind: input, shape index: {}]   ;;  %s3346_s2 = inlined_call_operand.vmem [shape: f32[1,32], index: 2, kind: input, shape index: {}]   ;;  %s3347_s3 = inlined_call_operand.vmem [shape: bf16[4,32,8], index: 3, kind: input, shape index: {}]   ;;  %s3348_s4 = inlined_call_operand.vmem [shape: f32[4,1,8], index: 4, kind: input, shape index: {}]   ;;  %s3349_s5 = inlined_call_operand.vmem [shape: bf16[4,32,8], index: 5, kind: input, shape index: {}]   ;;  %s3350_s6 = inlined_call_operand.vmem [shape: f32[4,1,8], index: 6, kind: input, shape index: {}]   ;;  %s3351_s7 = inlined_call_operand.vmem [shape: bf16[4,32,8], index: 7, kind: input, shape index: {}]   ;;  %s3352_s8 = inlined_call_operand.vmem [shape: f32[4,1,8], index: 8, kind: input, shape index: {}]   ;;  %s3353_s9 = inlined_call_operand.vmem [shape: bf16[4,8,32], index: 9, kind: input, shape index: {}]   ;;  %s3354_s10 = inlined_call_operand.vmem [shape: f32[1,32], index: 10, kind: input, shape index: {}]   ;;  %s3355_s11 = inlined_call_operand.vmem [shape: f32[1,32], index: 11, kind: input, shape index: {}]   ;;  %s3356_s12 = inlined_call_operand.vmem [shape: f32[1,32], index: 12, kind: input, shape index: {}]   ;;  %s3357_s13 = inlined_call_operand.vmem [shape: bf16[32,128], index: 13, kind: input, shape index: {}]   ;;  %s3358_s14 = inlined_call_operand.vmem [shape: f32[1,128], index: 14, kind: input, shape index: {}]   ;;  %s3359_s15 = inlined_call_operand.vmem [shape: bf16[128,32], index: 15, kind: input, shape index: {}]   ;;  %s3360_s16 = inlined_call_operand.vmem [shape: f32[1,32], index: 16, kind: input, shape index: {}]   ;;  %s3361_s17 = inlined_call_operand.hbm [shape: f32[2,8,32], index: 17, kind: output, shape index: {}]  }
   0x1   :  { %3365 = sst [smem:[#allocation8_spill]] %s3344_s0 }
   0x2   :  { %3366 = sst [smem:[#allocation9_spill]] %s3345_s1 }
   0x3   :  { %3367 = sst [smem:[#allocation10_spill]] %s3346_s2 }
   0x4   :  { %3368 = sst [smem:[#allocation11_spill]] %s3347_s3 }
   0x5   :  { %22 = vsyncpa [#allocation3], 0 }
   0x6   :  { %24 = vsyncpa [#allocation3 + $0x1], 0  ;;  %s2888_s24 = smov 0   ;;  %s2890_s25 = smov 0  }
   0x7   :  { %s2892_s26 = smov 0   ;;  %s2894_s27 = smov 0  }
   0x8 LB: > { %3369 = sst [smem:[#allocation5_spill]] %s2789_s26  ;;  %s2909_s28 = sadd.s32 4294967295, %s2793_s27   ;;  %s2793_s27 = sphi %s2894_s27, %s3378_s27   ;;  %s2789_s26 = sphi %s2892_s26, %s3380_s26   ;;  %s2785_s25 = sphi %s2890_s25, %s3382_s25   ;;  %s2781_s24 = sphi %s2888_s24, %s3381_s24  }
   0x9   : > { %s2278_s29 = sadd.s32 4294967294, %s2793_s27   ;;  %s2913_s0 = sadd.s32 1, %s2793_s27  }
   0xa   : > { %3370 = sst [smem:[#allocation6_spill]] %s2913_s0  ;;  %s399_s30 = sadd.s32 1, %s2789_s26 }
   0xb   : > { %s396_s18 = ssub.s32 %s2793_s27, %s2913_s0  ;;  %p409_p0 = scmp.ne.s32.totalorder %s2789_s26, %s2785_s25 }
   0xc   : > { %p397_p1 = scmp.eq.s32.totalorder %s396_s18, 0  ;;  %p410_p2 = scmp.eq.s32.totalorder %s2909_s28, 1 }
   0xd   : > { %p415_p3 = scmp.ne.s32.totalorder %s2785_s25, %s2781_s24  ;;  %p416_p4 = scmp.eq.s32.totalorder %s2278_s29, 1 }
   0xe   : > { %s2924_s19 = scalar_select %p397_p1, %s2789_s26, %s399_s30  }
   0xf   : > { %p2926_p5 = por %p410_p2, %p409_p0  ;;  %p2930_p6 = por %p416_p4, %p415_p3 }
  0x10   : > { %3371 = sst [smem:[#allocation7_spill]] %s2924_s19  ;;  %p2281_p7 = scmp.ge.s32.totalorder %s2793_s27, 1 }
  0x11   : > { %p489_p8 = scmp.lt.s32.totalorder %s2793_s27, 3 }
  0x13   : > { %p490_p9 = pnand %p2281_p7, %p489_p8 }
  0x14   : > { %p540_p10 = scmp.lt.s32.totalorder (!%p490_p9), %s2909_s28, 1  ;;  %vm548_vm0 = vcmask (!%p490_p9), 261120   ;;  %s3374_s30 = sld [smem:[#allocation8_spill]] (!%p490_p9)  ;;  %v2795_v9 = vmov (!%p490_p9), 0.0   ;;  %vm2796_vm1 = vmmov (!%p490_p9), 0   ;;  %v2680_v22 = vld [vmem:[%s3349_s5 + $0x10] sm:$0xff] (!%p490_p9)  }
  0x15   : > { %493 = sbr.rel (%p490_p9) target bundleno = 2350 (0x92e), region = 88  ;;  %s3375_s3 = sld [smem:[#allocation11_spill]] (!%p490_p9)  ;;  %2438 = vmatprep.subr.bf16.mxu0 (!%p490_p9), %v2795_v9  ;;  %2462 = vmatprep.subr.bf16.mxu1 (!%p490_p9), %v2795_v9  ;;  %v2682_v25 = vld [vmem:[%s3349_s5 + $0x18] sm:$0xff] (!%p490_p9)   ;;  %v2684_v27 = vld [vmem:[%s3349_s5 + $0x30] sm:$0xff] (!%p490_p9)   ;;  %v2687_v30 = vld [vmem:[%s3349_s5] sm:$0xff] (!%p490_p9)   ;;  %vm1345_vm2 = vcmask (!%p490_p9), 64512  }
  0x16   : > { %2442 = vmatprep.mubr.msk.bf16.mxu0 (!%p490_p9), %vm2796_vm1, %v2795_v9  ;;  %2466 = vmatprep.mubr.msk.bf16.mxu1 (!%p490_p9), %vm2796_vm1, %v2795_v9  ;;  %s3377_s2 = sld [smem:[#allocation10_spill]] (!%p490_p9)  ;;  %v2686_v29 = vld [vmem:[%s3349_s5 + $0x38] sm:$0xff] (!%p490_p9)   ;;  %v2688_v31 = vld [vmem:[%s3351_s7 + $0x10] sm:$0xff] (!%p490_p9)   ;;  %v2689_v32 = vld [vmem:[%s3349_s5 + $0x8] sm:$0xff] (!%p490_p9)   ;;  %vm1600_vm3 = vcmask (!%p490_p9), 1043456   ;;  %s2363_s23 = sshll.u32 (!%p490_p9), %s2909_s28, 7 }
  0x17   : > { %v2690_v33 = vld [vmem:[%s3351_s7 + $0x18] sm:$0xff] (!%p490_p9)   ;;  %v2691_v34 = vld [vmem:[%s3349_s5 + $0x20] sm:$0xff] (!%p490_p9)   ;;  %v2692_v35 = vld [vmem:[%s3351_s7 + $0x30] sm:$0xff] (!%p490_p9)  }
  0x18   : > { %v2693_v36 = vld [vmem:[%s3349_s5 + $0x28] sm:$0xff] (!%p490_p9)   ;;  %v2694_v37 = vld [vmem:[%s3351_s7 + $0x38] sm:$0xff] (!%p490_p9)   ;;  %v2695_v38 = vld [vmem:[%s3351_s7] sm:$0xff] (!%p490_p9)  }
  0x19   : > { %v2696_v39 = vld [vmem:[%s3351_s7 + $0x8] sm:$0xff] (!%p490_p9)   ;;  %v2697_v40 = vld [vmem:[%s3351_s7 + $0x20] sm:$0xff] (!%p490_p9)  }
  0x1a   : > { %v2698_v41 = vld [vmem:[%s3351_s7 + $0x28] sm:$0xff] (!%p490_p9)   ;;  %v2303_v50 = vld [vmem:[%s3350_s6 + $0x1] ss:$0 sm:$0xff] (!%p490_p9)  ;;  %v2305_v63 = vld [vmem:[%s3350_s6 + $0x3] ss:$0 sm:$0xff] (!%p490_p9) }
  0x1b   : > { %v2675_v7 = vld [vmem:[%s3375_s3] sm:$0xff] (!%p490_p9)   ;;  %v2676_v8 = vld [vmem:[%s3375_s3 + $0x30] sm:$0xff] (!%p490_p9)   ;;  %v2677_v10 = vld [vmem:[%s3375_s3 + $0x8] sm:$0xff] (!%p490_p9)  }
  0x1c   : > { %s541_s21 = scalar_select %p540_p10, %s2909_s28, 1  ;;  %2439 = vmatpush3.bf16.msra.mxu0 %v2675_v7  ;;  %2463 = vmatpush3.bf16.msra.mxu1 %v2676_v8  ;;  %v2678_v11 = vld [vmem:[%s3375_s3 + $0x38] sm:$0xff]   ;;  %v2285_v18 = vld [vmem:[%s3377_s2] ss:$0 sm:$0xff]  ;;  %v2679_v21 = vld [vmem:[%s3375_s3 + $0x10] sm:$0xff]  }
  0x1d   : > { %2440 = vmatprep.subr.bf16.mxu0 %v2795_v9  ;;  %2464 = vmatprep.subr.bf16.mxu1 %v2795_v9  ;;  %v2681_v24 = vld [vmem:[%s3375_s3 + $0x18] sm:$0xff]   ;;  %v2683_v26 = vld [vmem:[%s3375_s3 + $0x20] sm:$0xff]   ;;  %v2685_v28 = vld [vmem:[%s3375_s3 + $0x28] sm:$0xff]   ;;  %s3301_s2 = scalar_lea.hbm %s3361_s17, %s2363_s23 }
  0x1e   : > { %s2283_s22 = sshll.u32 %s541_s21, 3  ;;  %v2287_v61 = vld [vmem:[%s3348_s4 + $0x1] ss:$0 sm:$0xff] }
  0x1f   : > { %s543_s18 = scalar_lea.vmem %s3374_s30, %s2283_s22  ;;  %s3376_s22 = sld [smem:[#allocation9_spill]] }
  0x20   : > { %v2941_v0 = vld [vmem:[%s543_s18] sm:$0xff]  ;;  %2441 = vmatpush3.bf16.msra.mxu0 %v2677_v10  ;;  %2465 = vmatpush3.bf16.msra.mxu1 %v2678_v11  ;;  %s537_s30 = sand.u32 1, %s2785_s25   ;;  %s2797_s18 = smov [#allocation2]  }
  0x21   : > { %v549_v1 = vsel %vm548_vm0, %v2941_v0, 0.0  ;;  %2446 = vmatprep.subr.bf16.mxu0 %v2795_v9  ;;  %2478 = vmatprep.subr.bf16.mxu1 %v2795_v9  ;;  %s2282_s19 = sshll.u32 %s537_s30, 3  ;;  %s2206_s28 = scalar_lea.sflag [#allocation3], %s537_s30 }
  0x22   : > { %550 = vadd.xlane.f32.xlu0 %v549_v1  ;;  %s2735_s21 = sshll.u32 %s2797_s18, 4  ;;  %s2736_s21 = int_to_ptr.vmem [resolvable:$false] %s2735_s21 }
  0x23   : > { %s2737_s3 = scalar_lea.vmem %s2736_s21, 256 }
  0x25   : > { %v2284_v16 = vld [vmem:[%s3376_s22] ss:$0 sm:$0xff]  ;;  %s539_s22 = scalar_lea.vmem [#allocation2], %s2282_s19 }
  0x26   : > { %s2219_s29 = sshll.u32 %s539_s22, 4  ;;  %s3303_s29 = int_to_ptr.vmem [resolvable:$true] %s2219_s29 }
  0x27   : > { %s2731_s19 = scalar_lea.vmem %s3303_s29, 128  ;;  %p2738_p0 = scmp.lt.s32.totalorder %s3303_s29, %s2736_s21 }
  0x28   : > { %p2732_p11 = scmp.ne.s32.totalorder %s3303_s29, %s2731_s19  ;;  %p2739_p1 = scmp.lt.s32.totalorder %s2737_s3, %s2731_s19 }
  0x2a   : > { %p2733_p12 = pnand %p2732_p11, %p2926_p5  ;;  %p2740_p2 = por %p2739_p1, %p2738_p0 }
  0x2c   : > { %p2734_p13 = pneg %p2733_p12 }
  0x2e   : > { %p2741_p3 = pnand %p2740_p2, %p2734_p13 }
  0xaf   : > { %v551_v2 = vpop.xlane.xlu0 %550 }
  0xb0   : > { %v553_v3 = vmul.f32 0.03125, %v551_v2 }
  0xb2   : > { %v554_v4 = vsub.f32 %v2941_v0, %v553_v3 }
  0xb4   : > { %v555_v5 = vmul.f32 %v554_v4, %v554_v4 }
  0xb6   : > { %v556_v6 = vsel %vm548_vm0, %v555_v5, 0.0 }
  0xb7   : > { %557 = vadd.xlane.f32.xlu0 %v556_v6 }
 0x144   : > { %v558_v12 = vpop.xlane.xlu0 %557 }
 0x145   : > { %v559_v13 = vmul.f32 0.03125, %v558_v12 }
 0x147   : > { %v560_v14 = vadd.f32 1e-05, %v559_v13 }
 0x149   : > { %2709 = vrsqrt.f32 %v560_v14  ;;  %v2289_v14 = vld [vmem:[%s3348_s4 + $0x3] ss:$0 sm:$0xff] }
 0x153   : > { %v2710_v15 = vpop.eup %2709 }
 0x154   : > { %v562_v17 = vmul.f32 %v2710_v15, %v554_v4 }
 0x156   : > { %v569_v19 = vmul.f32 %v2284_v16, %v562_v17  ;;  %v2302_v16 = vld [vmem:[%s3350_s6] ss:$0 sm:$0xff]  ;;  %v2319_v17 = vld [vmem:[%s3352_s8 + $0x1] ss:$0 sm:$0xff] }
 0x158   : > { %v576_v20 = vadd.f32 %v2285_v18, %v569_v19 }
 0x15a   : > { %v2981_v23 = vpack.c.bf16 %v576_v20, %v576_v20 }
 0x15c   : > { %2443 = vmatmul.mubr.msk.bf16.vlgmr.msra.gmra.mrb[0].mxu0 %vm548_vm0, %v2981_v23  ;;  %2467 = vmatmul.mubr.msk.bf16.vlgmr.msra.gmra.mrb[0].mxu1 %vm548_vm0, %v2981_v23 }
 0x15d   : > { %2447 = vmatpush3.bf16.msra.mxu0 %v2679_v21  ;;  %2479 = vmatpush3.bf16.msra.mxu1 %v2680_v22 }
 0x15e   : > { %2448 = vmatprep.subr.bf16.mxu0 %v2795_v9  ;;  %2480 = vmatprep.subr.bf16.mxu1 %v2795_v9 }
 0x15f   : > { %2450 = vmatprep.mubr.msk.bf16.mxu0 %vm2796_vm1, %v2795_v9  ;;  %2482 = vmatprep.mubr.msk.bf16.mxu1 %vm2796_vm1, %v2795_v9 }
 0x161   : > { %2449 = vmatpush3.bf16.msra.mxu0 %v2681_v24  ;;  %2481 = vmatpush3.bf16.msra.mxu1 %v2682_v25 }
 0x162   : > { %2454 = vmatprep.subr.bf16.mxu0 %v2795_v9  ;;  %2494 = vmatprep.subr.bf16.mxu1 %v2795_v9 }
 0x164   : > { %2451 = vmatmul.mubr.msk.bf16.vlgmr.msra.gmra.mrb[4].mxu0 %vm548_vm0, %v2981_v23  ;;  %2483 = vmatmul.mubr.msk.bf16.vlgmr.msra.gmra.mrb[4].mxu1 %vm548_vm0, %v2981_v23 }
 0x165   : > { %2455 = vmatpush3.bf16.msra.mxu0 %v2683_v26  ;;  %2495 = vmatpush3.bf16.msra.mxu1 %v2684_v27 }
 0x166   : > { %2456 = vmatprep.subr.bf16.mxu0 %v2795_v9  ;;  %2496 = vmatprep.subr.bf16.mxu1 %v2795_v9 }
 0x167   : > { %2458 = vmatprep.mubr.msk.bf16.mxu0 %vm2796_vm1, %v2795_v9  ;;  %2498 = vmatprep.mubr.msk.bf16.mxu1 %vm2796_vm1, %v2795_v9 }
 0x169   : > { %2457 = vmatpush3.bf16.msra.mxu0 %v2685_v28  ;;  %2497 = vmatpush3.bf16.msra.mxu1 %v2686_v29 }
 0x16a   : > { %2470 = vmatprep.subr.bf16.mxu0 %v2795_v9  ;;  %2510 = vmatprep.subr.bf16.mxu1 %v2795_v9 }
 0x16c   : > { %2459 = vmatmul.mubr.msk.bf16.vlgmr.msra.gmra.mrb[8].mxu0 %vm548_vm0, %v2981_v23  ;;  %2499 = vmatmul.mubr.msk.bf16.vlgmr.msra.gmra.mrb[8].mxu1 %vm548_vm0, %v2981_v23 }
 0x16d   : > { %2471 = vmatpush3.bf16.msra.mxu0 %v2687_v30  ;;  %2511 = vmatpush3.bf16.msra.mxu1 %v2688_v31 }
 0x16e   : > { %2472 = vmatprep.subr.bf16.mxu0 %v2795_v9  ;;  %2512 = vmatprep.subr.bf16.mxu1 %v2795_v9 }
 0x16f   : > { %2474 = vmatprep.mubr.msk.bf16.mxu0 %vm2796_vm1, %v2795_v9  ;;  %2514 = vmatprep.mubr.msk.bf16.mxu1 %vm2796_vm1, %v2795_v9 }
 0x171   : > { %2473 = vmatpush3.bf16.msra.mxu0 %v2689_v32  ;;  %2513 = vmatpush3.bf16.msra.mxu1 %v2690_v33  ;;  %v2286_v32 = vld [vmem:[%s3348_s4] ss:$0 sm:$0xff] }
 0x172   : > { %2486 = vmatprep.subr.bf16.mxu0 %v2795_v9  ;;  %2526 = vmatprep.subr.bf16.mxu1 %v2795_v9 }
 0x174   : > { %2475 = vmatmul.mubr.msk.bf16.vlgmr.msra.gmra.mrb[12].mxu0 %vm548_vm0, %v2981_v23  ;;  %2515 = vmatmul.mubr.msk.bf16.vlgmr.msra.gmra.mrb[12].mxu1 %vm548_vm0, %v2981_v23 }
 0x175   : > { %2487 = vmatpush3.bf16.msra.mxu0 %v2691_v34  ;;  %2527 = vmatpush3.bf16.msra.mxu1 %v2692_v35  ;;  %v2304_v35 = vld [vmem:[%s3350_s6 + $0x2] ss:$0 sm:$0xff] }
 0x176   : > { %2488 = vmatprep.subr.bf16.mxu0 %v2795_v9  ;;  %2528 = vmatprep.subr.bf16.mxu1 %v2795_v9 }
 0x177   : > { %2490 = vmatprep.mubr.msk.bf16.mxu0 %vm2796_vm1, %v2795_v9  ;;  %2530 = vmatprep.mubr.msk.bf16.mxu1 %vm2796_vm1, %v2795_v9 }
 0x179   : > { %2489 = vmatpush3.bf16.msra.mxu0 %v2693_v36  ;;  %2529 = vmatpush3.bf16.msra.mxu1 %v2694_v37 }
 0x17a   : > { %2502 = vmatprep.subr.bf16.mxu0 %v2795_v9  ;;  %2540 = vmatprep.subr.bf16.mxu1 %v2795_v9 }
 0x17c   : > { %2491 = vmatmul.mubr.msk.bf16.vlgmr.msra.gmra.mrb[16].mxu0 %vm548_vm0, %v2981_v23  ;;  %2531 = vmatmul.mubr.msk.bf16.vlgmr.msra.gmra.mrb[16].mxu1 %vm548_vm0, %v2981_v23 }
 0x17d   : > { %2503 = vmatpush3.bf16.msra.mxu0 %v2695_v38  ;;  %2506 = vmatprep.mubr.msk.bf16.mxu0 %vm2796_vm1, %v2795_v9 }
 0x17e   : > { %2504 = vmatprep.subr.bf16.mxu0 %v2795_v9  ;;  %2542 = vmatprep.mubr.msk.bf16.mxu1 %vm2796_vm1, %v2795_v9 }
 0x181   : > { %2505 = vmatpush3.bf16.msra.mxu0 %v2696_v39 }
 0x182   : > { %2518 = vmatprep.subr.bf16.mxu0 %v2795_v9 }
 0x184   : > { %2507 = vmatmul.mubr.msk.bf16.vlgmr.msra.gmra.mrb[20].mxu0 %vm548_vm0, %v2981_v23 }
 0x185   : > { %2519 = vmatpush3.bf16.msra.mxu0 %v2697_v40  ;;  %2522 = vmatprep.mubr.msk.bf16.mxu0 %vm2796_vm1, %v2795_v9 }
 0x186   : > { %2520 = vmatprep.subr.bf16.mxu0 %v2795_v9 }
 0x189   : > { %2521 = vmatpush3.bf16.msra.mxu0 %v2698_v41 }
 0x18a   : > { %2534 = vmatprep.subr.bf16.mxu0 %v2795_v9 }
 0x18c   : > { %2523 = vmatmul.mubr.msk.bf16.vlgmr.msra.gmra.mrb[24].mxu0 %vm548_vm0, %v2981_v23 }
 0x18d   : > { %2536 = vmatprep.mubr.msk.bf16.mxu0 %vm2796_vm1, %v2795_v9 }
 0x22f   : > { %v3105_v42 = vpop.f32.mrb[0].mxu0  ;;  %v827_v43 = vpop.f32.mrb[0].mxu1 }
 0x230   : > { %v2444_v44 = vpop.f32.mrb[1].mxu0  ;;  %v2468_v45 = vpop.f32.mrb[1].mxu1  ;;  %v828_v18 = vadd.f32 %v2289_v14, %v827_v43  ;;  %v672_v36 = vadd.f32 %v2286_v32, %v3105_v42  ;;  %v2288_v42 = vld [vmem:[%s3348_s4 + $0x2] ss:$0 sm:$0xff] }
 0x231   : > { %v674_v46 = vpop.f32.mrb[2].mxu0  ;;  %v830_v47 = vpop.f32.mrb[2].mxu1 }
 0x232   : > { %v2445_v48 = vpop.f32.mrb[3].mxu0  ;;  %v2469_v49 = vpop.f32.mrb[3].mxu1  ;;  %v1340_v27 = vpack.c.bf16 %v828_v18, %v828_v18  ;;  %v1337_v45 = vpack.c.bf16 %v672_v36, %v672_v36 }
 0x237   : > { %v723_v51 = vpop.f32.mrb[4].mxu0  ;;  %v975_v52 = vpop.f32.mrb[4].mxu1 }
 0x238   : > { %v976_v53 = vadd.f32 %v2303_v50, %v975_v52  ;;  %v2452_v54 = vpop.f32.mrb[5].mxu0  ;;  %v2484_v55 = vpop.f32.mrb[5].mxu1  ;;  %v724_v1 = vadd.f32 %v2287_v61, %v723_v51  ;;  %v2318_v50 = vld [vmem:[%s3352_s8] ss:$0 sm:$0xff] }
 0x239   : > { %v726_v56 = vpop.f32.mrb[6].mxu0  ;;  %v978_v57 = vpop.f32.mrb[6].mxu1 }
 0x23a   : > { %v1342_v58 = vpack.c.bf16 %v976_v53, %v976_v53  ;;  %v2453_v59 = vpop.f32.mrb[7].mxu0  ;;  %v2485_v60 = vpop.f32.mrb[7].mxu1  ;;  %v1338_v10 = vpack.c.bf16 %v724_v1, %v724_v1 }
 0x23c   : > { %v1396_v62 = vsel %vm1345_vm2, %v1342_v58, 0 }
 0x23d   : > { %2541 = vmatpush3.bf16.xpose.msra.mxu1 %v1396_v62 }
 0x23e   : > { %2552 = vmatprep.subr.bf16.mxu1 %v2795_v9 }
 0x23f   : > { %v775_v2 = vpop.f32.mrb[8].mxu0  ;;  %v1079_v3 = vpop.f32.mrb[8].mxu1 }
 0x240   : > { %v1080_v4 = vadd.f32 %v2305_v63, %v1079_v3  ;;  %v2460_v5 = vpop.f32.mrb[9].mxu0  ;;  %v2500_v6 = vpop.f32.mrb[9].mxu1  ;;  %v776_v51 = vadd.f32 %v2288_v42, %v775_v2 }
 0x241   : > { %v778_v7 = vpop.f32.mrb[10].mxu0  ;;  %v1082_v8 = vpop.f32.mrb[10].mxu1 }
 0x242   : > { %v1344_v11 = vpack.c.bf16 %v1080_v4, %v1080_v4  ;;  %v2461_v12 = vpop.f32.mrb[11].mxu0  ;;  %v2501_v13 = vpop.f32.mrb[11].mxu1  ;;  %v1339_v56 = vpack.c.bf16 %v776_v51, %v776_v51  ;;  %v1534_v8 = vlaneseq }
 0x244   : > { %v1488_v15 = vsel %vm1345_vm2, %v1344_v11, 0  ;;  %2543 = vmatmul.mubr.msk.bf16.vlgmr.msra.gmra.mrb[20].mxu1 %vm1345_vm2, %v1338_v10  ;;  %v1535_v11 = vshrl.u32 %v1534_v8, 7  ;;  %v1537_v12 = vand.u32 127, %v1534_v8 }
 0x245   : > { %2553 = vmatpush3.bf16.xpose.msra.mxu1 %v1488_v15  ;;  %2554 = vmatprep.mubr.msk.bf16.mxu1 %vm2796_vm1, %v2795_v9 }
 0x246   : > { %2564 = vmatprep.subr.bf16.mxu1 %v2795_v9  ;;  %vm1538_vm4 = vcmp.ge.s32.totalorder %v1535_v11, %v1537_v12  ;;  %v1786_v11 = vld [vmem:[%s3353_s9] sm:$0xf] }
 0x247   : > { %v923_v19 = vpop.f32.mrb[12].mxu0  ;;  %v1227_v20 = vpop.f32.mrb[12].mxu1 }
 0x248   : > { %v924_v21 = vadd.f32 %v2302_v16, %v923_v19  ;;  %v1228_v22 = vadd.f32 %v2319_v17, %v1227_v20  ;;  %v2476_v23 = vpop.f32.mrb[13].mxu0  ;;  %v2516_v24 = vpop.f32.mrb[13].mxu1 }
 0x249   : > { %v926_v25 = vpop.f32.mrb[14].mxu0  ;;  %v1230_v26 = vpop.f32.mrb[14].mxu1 }
 0x24a   : > { %v1341_v28 = vpack.c.bf16 %v924_v21, %v924_v21  ;;  %v1594_v29 = vpack.c.bf16 %v1228_v22, %v1228_v22  ;;  %v2477_v30 = vpop.f32.mrb[15].mxu0  ;;  %v2517_v31 = vpop.f32.mrb[15].mxu1 }
 0x24c   : > { %v1350_v33 = vsel %vm1345_vm2, %v1341_v28, 0  ;;  %v1648_v34 = vsel %vm1600_vm3, %v1594_v29, 0  ;;  %2555 = vmatmul.mubr.msk.bf16.vlgmr.msra.gmra.mrb[24].mxu1 %vm1345_vm2, %v1340_v27 }
 0x24d   : > { %2535 = vmatpush3.bf16.xpose.msra.mxu0 %v1350_v33  ;;  %2565 = vmatpush3.bf16.msra.mxu1 %v1648_v34 }
 0x24e   : > { %2546 = vmatprep.subr.bf16.mxu0 %v2795_v9  ;;  %2566 = vmatprep.mubr.msk.bf16.mxu1 %vm2796_vm1, %v2795_v9 }
 0x24f   : > { %v1027_v37 = vpop.f32.mrb[16].mxu0  ;;  %v3145_v38 = vpop.f32.mrb[16].mxu1  ;;  %2576 = vmatprep.subr.bf16.mxu1 %v2795_v9 }
 0x250   : > { %v1028_v39 = vadd.f32 %v2304_v35, %v1027_v37  ;;  %v2492_v40 = vpop.f32.mrb[17].mxu0  ;;  %v2532_v41 = vpop.f32.mrb[17].mxu1 }
 0x251   : > { %v1030_v43 = vpop.f32.mrb[18].mxu0  ;;  %v1334_v44 = vpop.f32.mrb[18].mxu1 }
 0x252   : > { %v1343_v46 = vpack.c.bf16 %v1028_v39, %v1028_v39  ;;  %v2493_v47 = vpop.f32.mrb[19].mxu0  ;;  %v2533_v48 = vpop.f32.mrb[19].mxu1 }
 0x254   : > { %v1442_v49 = vsel %vm1345_vm2, %v1343_v46, 0  ;;  %2537 = vmatmul.mubr.msk.bf16.vlgmr.msra.gmra.mrb[28].mxu0 %vm1345_vm2, %v1337_v45 }
 0x255   : > { %2547 = vmatpush3.bf16.xpose.msra.mxu0 %v1442_v49  ;;  %2548 = vmatprep.mubr.msk.bf16.mxu0 %vm2796_vm1, %v2795_v9 }
 0x256   : > { %2558 = vmatprep.subr.bf16.mxu0 %v2795_v9 }
 0x257   : > { %v1175_v52 = vpop.f32.mrb[20].mxu0 }
 0x258   : > { %v1176_v53 = vadd.f32 %v2318_v50, %v1175_v52  ;;  %v2508_v54 = vpop.f32.mrb[21].mxu0 }
 0x259   : > { %v1178_v55 = vpop.f32.mrb[22].mxu0 }
 0x25a   : > { %v1593_v57 = vpack.c.bf16 %v1176_v53, %v1176_v53  ;;  %v2509_v58 = vpop.f32.mrb[23].mxu0 }
 0x25c   : > { %v1602_v59 = vsel %vm1600_vm3, %v1593_v57, 0  ;;  %2549 = vmatmul.mubr.msk.bf16.vlgmr.msra.gmra.mrb[32].mxu0 %vm1345_vm2, %v1339_v56  ;;  %v2320_v56 = vld [vmem:[%s3352_s8 + $0x2] ss:$0 sm:$0xff] }
 0x25d   : > { %2559 = vmatpush3.bf16.msra.mxu0 %v1602_v59  ;;  %2560 = vmatprep.mubr.msk.bf16.mxu0 %vm2796_vm1, %v2795_v9  ;;  %v2321_v59 = vld [vmem:[%s3352_s8 + $0x3] ss:$0 sm:$0xff] }
 0x25e   : > { %2570 = vmatprep.subr.bf16.mxu0 %v2795_v9 }
 0x25f   : > { %v3164_v60 = vpop.f32.mrb[24].mxu0 }
 0x260   : > { %v2524_v61 = vpop.f32.mrb[25].mxu0  ;;  %v1280_v57 = vadd.f32 %v2320_v56, %v3164_v60 }
 0x261   : > { %v1282_v62 = vpop.f32.mrb[26].mxu0 }
 0x262   : > { %v2525_v63 = vpop.f32.mrb[27].mxu0 }
 0x263   : > { %v1332_v63 = vadd.f32 %v2321_v59, %v3145_v38 }
 0x317   : > { %v1432_v1 = vpop.f32.mrb[20].mxu1 }
 0x318   : > { %v2544_v2 = vpop.f32.mrb[21].mxu1  ;;  %v1531_v14 = vmul.f32 0.35355338, %v1432_v1  ;;  %v1595_v1 = vpack.c.bf16 %v1280_v57, %v1280_v57 }
 0x319   : > { %v1435_v3 = vpop.f32.mrb[22].mxu1 }
 0x31a   : > { %v2545_v4 = vpop.f32.mrb[23].mxu1  ;;  %v1542_v22 = vsel %vm1538_vm4, %v1531_v14, -inf }
 0x31b   : > { %v1548_v24 = vsel %vm1345_vm2, %v1542_v22, -inf }
 0x31f   : > { %v1524_v5 = vpop.f32.mrb[24].mxu1 }
 0x320   : > { %v2556_v6 = vpop.f32.mrb[25].mxu1  ;;  %v1533_v21 = vmul.f32 0.35355338, %v1524_v5  ;;  %v1596_v5 = vpack.c.bf16 %v1332_v63, %v1332_v63 }
 0x321   : > { %v1527_v7 = vpop.f32.mrb[26].mxu1  ;;  %v1694_v6 = vsel %vm1600_vm3, %v1595_v1, 0 }
 0x322   : > { %v2557_v10 = vpop.f32.mrb[27].mxu1  ;;  %v1544_v27 = vsel %vm1538_vm4, %v1533_v21, -inf  ;;  %v1740_v38 = vsel %vm1600_vm3, %v1596_v5, 0  ;;  %v2346_v5 = vld [vmem:[%s3354_s10] ss:$0 sm:$0xff] }
 0x323   : > { %v1554_v31 = vsel %vm1345_vm2, %v1544_v27, -inf }
 0x327   : > { %v1386_v13 = vpop.f32.mrb[28].mxu0 }
 0x328   : > { %v1530_v15 = vmul.f32 0.35355338, %v1386_v13  ;;  %v2538_v16 = vpop.f32.mrb[29].mxu0 }
 0x329   : > { %v1389_v17 = vpop.f32.mrb[30].mxu0 }
 0x32a   : > { %v2539_v18 = vpop.f32.mrb[31].mxu0  ;;  %v1541_v19 = vsel %vm1538_vm4, %v1530_v15, -inf  ;;  %v1794_v15 = vsel %vm1600_vm3, %v1786_v11, 0  ;;  %v1787_v17 = vld [vmem:[%s3353_s9 + $0x4] sm:$0xf] }
 0x32b   : > { %v1545_v20 = vsel %vm1345_vm2, %v1541_v19, -inf  ;;  %v1840_v18 = vsel %vm1600_vm3, %v1787_v17, 0 }
 0x32c   : > { %1546 = vmax.xlane.f32.xlu1 %v1545_v20 }
 0x32f   : > { %v1478_v23 = vpop.f32.mrb[32].mxu0 }
 0x330   : > { %v1532_v25 = vmul.f32 0.35355338, %v1478_v23  ;;  %1549 = vmax.xlane.f32.xlu1 %v1548_v24  ;;  %v2550_v26 = vpop.f32.mrb[33].mxu0 }
 0x331   : > { %v1481_v28 = vpop.f32.mrb[34].mxu0 }
 0x332   : > { %v2551_v29 = vpop.f32.mrb[35].mxu0  ;;  %v1543_v30 = vsel %vm1538_vm4, %v1532_v25, -inf  ;;  %v1789_v25 = vld [vmem:[%s3353_s9 + $0xc] sm:$0xf] }
 0x333   : > { %v1551_v32 = vsel %vm1345_vm2, %v1543_v30, -inf }
 0x334   : > { %1555 = vmax.xlane.f32.xlu1 %v1554_v31  ;;  %1552 = vmax.xlane.f32.xlu0 %v1551_v32 }
 0x3b9   : > { %v1547_v33 = vpop.xlane.xlu1 %1546 }
 0x3ba   : > { %v1557_v34 = vsub.f32 %v1541_v19, %v1547_v33  ;;  %v1788_v19 = vld [vmem:[%s3353_s9 + $0x8] sm:$0xf] }
 0x3bb   : > { %v1886_v23 = vsel %vm1600_vm3, %v1788_v19, 0 }
 0x3bc   : > { %v1561_v35 = vmul.f32 1.442695, %v1557_v34 }
 0x3bd   : > { %v1550_v36 = vpop.xlane.xlu1 %1549 }
 0x3be   : > { %2711 = vpow2.f32 %v1561_v35  ;;  %v1558_v37 = vsub.f32 %v1542_v22, %v1550_v36 }
 0x3c0   : > { %v1563_v39 = vmul.f32 1.442695, %v1558_v37 }
 0x3c1   : > { %v1556_v40 = vpop.xlane.xlu1 %1555  ;;  %v1553_v41 = vpop.xlane.xlu0 %1552 }
 0x3c2   : > { %2713 = vpow2.f32 %v1563_v39  ;;  %v1560_v43 = vsub.f32 %v1544_v27, %v1556_v40  ;;  %v1559_v44 = vsub.f32 %v1543_v30, %v1553_v41  ;;  %v1932_v30 = vsel %vm1600_vm3, %v1789_v25, 0 }
 0x3c4   : > { %v1567_v45 = vmul.f32 1.442695, %v1560_v43  ;;  %v1565_v46 = vmul.f32 1.442695, %v1559_v44 }
 0x3c6   : > { %2715 = vpow2.f32 %v1567_v45 }
 0x3c7   : > { %2717 = vpow2.f32 %v1565_v46 }
 0x3c8   : > { %v2712_v47 = vpop.eup %2711 }
 0x3c9   : > { %v1569_v48 = vsel %vm1345_vm2, %v2712_v47, 0.0 }
 0x3ca   : > { %1570 = vadd.xlane.f32.xlu0 %v1569_v48 }
 0x3cc   : > { %v2714_v42 = vpop.eup %2713 }
 0x3cd   : > { %v1572_v49 = vsel %vm1345_vm2, %v2714_v42, 0.0 }
 0x3ce   : > { %1573 = vadd.xlane.f32.xlu1 %v1572_v49 }
 0x3d0   : > { %v2716_v50 = vpop.eup %2715 }
 0x3d1   : > { %v2718_v51 = vpop.eup %2717  ;;  %v1578_v52 = vsel %vm1345_vm2, %v2716_v50, 0.0 }
 0x3d2   : > { %1579 = vadd.xlane.f32.xlu1 %v1578_v52  ;;  %v1575_v53 = vsel %vm1345_vm2, %v2718_v51, 0.0 }
 0x3d3   : > { %1576 = vadd.xlane.f32.xlu0 %v1575_v53 }
 0x457   : > { %v1571_v54 = vpop.xlane.xlu0 %1570 }
 0x458   : > { %2719 = vrcp.f32 %v1571_v54 }
 0x45b   : > { %v1574_v55 = vpop.xlane.xlu1 %1573 }
 0x45c   : > { %2721 = vrcp.f32 %v1574_v55 }
 0x45f   : > { %v1580_v58 = vpop.xlane.xlu1 %1579 }
 0x460   : > { %2723 = vrcp.f32 %v1580_v58  ;;  %v1577_v61 = vpop.xlane.xlu0 %1576 }
 0x461   : > { %2725 = vrcp.f32 %v1577_v61 }
 0x462   : > { %v2720_v62 = vpop.eup %2719 }
 0x463   : > { %v1585_v2 = vmul.f32 %v2720_v62, %v2712_v47 }
 0x465   : > { %v1589_v3 = vpack.c.bf16 %v1585_v2, %v1585_v2 }
 0x466   : > { %v2722_v4 = vpop.eup %2721 }
 0x467   : > { %v1586_v7 = vmul.f32 %v2722_v4, %v2714_v42  ;;  %2561 = vmatmul.mubr.msk.bf16.vlgmr.msra.gmra.mrb[36].mxu0 %vm1345_vm2, %v1589_v3 }
 0x468   : > { %2571 = vmatpush3.bf16.msra.mxu0 %v1694_v6  ;;  %2572 = vmatprep.mubr.msk.bf16.mxu0 %vm2796_vm1, %v2795_v9 }
 0x469   : > { %v1590_v60 = vpack.c.bf16 %v1586_v7, %v1586_v7  ;;  %2582 = vmatprep.subr.bf16.mxu0 %v2795_v9 }
 0x46a   : > { %v2724_v8 = vpop.eup %2723 }
 0x46b   : > { %v2726_v10 = vpop.eup %2725  ;;  %2567 = vmatmul.mubr.msk.bf16.vlgmr.msra.gmra.mrb[28].mxu1 %vm1345_vm2, %v1590_v60  ;;  %v1588_v13 = vmul.f32 %v2724_v8, %v2716_v50 }
 0x46c   : > { %v1587_v12 = vmul.f32 %v2726_v10, %v2718_v51  ;;  %2577 = vmatpush3.bf16.msra.mxu1 %v1740_v38  ;;  %2578 = vmatprep.mubr.msk.bf16.mxu1 %vm2796_vm1, %v2795_v9 }
 0x46d   : > { %2588 = vmatprep.subr.bf16.mxu1 %v2795_v9  ;;  %v1592_v16 = vpack.c.bf16 %v1588_v13, %v1588_v13  ;;  %v2699_v13 = vld [vmem:[%s3357_s13] sm:$0xff]  }
 0x46e   : > { %v1591_v14 = vpack.c.bf16 %v1587_v12, %v1587_v12 }
 0x470   : > { %2573 = vmatmul.mubr.msk.bf16.vlgmr.msra.gmra.mrb[40].mxu0 %vm1345_vm2, %v1591_v14  ;;  %v2701_v14 = vld [vmem:[%s3359_s15] sm:$0xff]  }
 0x471   : > { %2583 = vmatpush3.bf16.msra.mxu0 %v1794_v15  ;;  %2584 = vmatprep.mubr.msk.bf16.mxu0 %vm2796_vm1, %v2795_v9  ;;  %v2702_v15 = vld [vmem:[%s3359_s15 + $0x8] sm:$0xff]  }
 0x472   : > { %2594 = vmatprep.subr.bf16.mxu0 %v2795_v9 }
 0x473   : > { %2579 = vmatmul.mubr.msk.bf16.vlgmr.msra.gmra.mrb[32].mxu1 %vm1345_vm2, %v1592_v16  ;;  %v2703_v16 = vld [vmem:[%s3359_s15 + $0x10] sm:$0xff]  }
 0x474   : > { %2590 = vmatprep.mubr.msk.bf16.mxu1 %vm2796_vm1, %v2795_v9  ;;  %2589 = vmatpush3.bf16.msra.mxu1 %v1840_v18 }
 0x475   : > { %2600 = vmatprep.subr.bf16.mxu1 %v2795_v9 }
 0x53a   : > { %v1638_v20 = vpop.f32.mrb[36].mxu0 }
 0x53b   : > { %v1782_v21 = vpack.c.bf16 %v1638_v20, %v1638_v20  ;;  %v2562_v22 = vpop.f32.mrb[37].mxu0 }
 0x53c   : > { %v1641_v24 = vpop.f32.mrb[38].mxu0 }
 0x53d   : > { %v2563_v26 = vpop.f32.mrb[39].mxu0  ;;  %2585 = vmatmul.mubr.msk.bf16.vlgmr.msra.gmra.mrb[44].mxu0 %vm1345_vm2, %v1782_v21  ;;  %v2347_v21 = vld [vmem:[%s3355_s11] ss:$0 sm:$0xff] }
 0x53e   : > { %v1684_v27 = vpop.f32.mrb[28].mxu1  ;;  %2595 = vmatpush3.bf16.msra.mxu0 %v1886_v23  ;;  %2596 = vmatprep.mubr.msk.bf16.mxu0 %vm2796_vm1, %v2795_v9  ;;  %v2348_v23 = vld [vmem:[%s3356_s12] ss:$0 sm:$0xff] }
 0x53f   : > { %v1783_v28 = vpack.c.bf16 %v1684_v27, %v1684_v27  ;;  %v2568_v29 = vpop.f32.mrb[29].mxu1  ;;  %2606 = vmatprep.subr.bf16.mxu0 %v2795_v9  ;;  %v2704_v27 = vld [vmem:[%s3359_s15 + $0x18] sm:$0xff]  }
 0x540   : > { %v1687_v31 = vpop.f32.mrb[30].mxu1  ;;  %v2706_v29 = vld [vmem:[%s3359_s15 + $0x28] sm:$0xff]  }
 0x541   : > { %v2569_v32 = vpop.f32.mrb[31].mxu1  ;;  %2591 = vmatmul.mubr.msk.bf16.vlgmr.msra.gmra.mrb[36].mxu1 %vm1345_vm2, %v1783_v28  ;;  %v2705_v28 = vld [vmem:[%s3359_s15 + $0x20] sm:$0xff]   ;;  %v2708_v31 = vld [vmem:[%s3359_s15 + $0x38] sm:$0xff]  }
 0x542   : > { %2601 = vmatpush3.bf16.msra.mxu1 %v1932_v30  ;;  %2602 = vmatprep.mubr.msk.bf16.mxu1 %vm2796_vm1, %v2795_v9  ;;  %v2707_v30 = vld [vmem:[%s3359_s15 + $0x30] sm:$0xff]   ;;  %v2349_v32 = vld [vmem:[%s3358_s14] ss:$0 sm:$0xff] }
 0x543   : > { %v1730_v33 = vpop.f32.mrb[40].mxu0  ;;  %2614 = vmatprep.subr.bf16.mxu1 %v2795_v9 }
 0x544   : > { %v1784_v34 = vpack.c.bf16 %v1730_v33, %v1730_v33  ;;  %v2574_v35 = vpop.f32.mrb[41].mxu0 }
 0x545   : > { %v1733_v36 = vpop.f32.mrb[42].mxu0 }
 0x546   : > { %v2575_v37 = vpop.f32.mrb[43].mxu0  ;;  %2597 = vmatmul.mubr.msk.bf16.vlgmr.msra.gmra.mrb[48].mxu0 %vm1345_vm2, %v1784_v34  ;;  %v1776_v39 = vpop.f32.mrb[32].mxu1 }
 0x547   : > { %v1785_v40 = vpack.c.bf16 %v1776_v39, %v1776_v39  ;;  %v2580_v41 = vpop.f32.mrb[33].mxu1  ;;  %2610 = vmatprep.mubr.msk.bf16.mxu0 %vm2796_vm1, %v2795_v9  ;;  %2607 = vmatpush3.bf16.msra.mxu0 %v2699_v13 }
 0x548   : > { %v1779_v43 = vpop.f32.mrb[34].mxu1  ;;  %2608 = vmatprep.subr.bf16.mxu0 %v2795_v9 }
 0x549   : > { %v2581_v44 = vpop.f32.mrb[35].mxu1  ;;  %2603 = vmatmul.mubr.msk.bf16.vlgmr.msra.gmra.mrb[40].mxu1 %vm1345_vm2, %v1785_v40 }
 0x54a   : > { %2630 = vmatprep.mubr.msk.bf16.mxu1 %vm2796_vm1, %v2795_v9  ;;  %2615 = vmatpush3.bf16.msra.mxu1 %v2701_v14 }
 0x54b   : > { %2616 = vmatprep.subr.bf16.mxu1 %v2795_v9 }
 0x54e   : > { %2617 = vmatpush3.bf16.msra.mxu1 %v2702_v15 }
 0x54f   : > { %2618 = vmatprep.subr.bf16.mxu1 %v2795_v9 }
 0x552   : > { %2619 = vmatpush3.bf16.msra.mxu1 %v2703_v16 }
 0x553   : > { %2620 = vmatprep.subr.bf16.mxu1 %v2795_v9 }
 0x556   : > { %2621 = vmatpush3.bf16.msra.mxu1 %v2704_v27 }
 0x557   : > { %2622 = vmatprep.subr.bf16.mxu1 %v2795_v9 }
 0x55a   : > { %2623 = vmatpush3.bf16.msra.mxu1 %v2705_v28 }
 0x55b   : > { %2624 = vmatprep.subr.bf16.mxu1 %v2795_v9 }
 0x55e   : > { %2625 = vmatpush3.bf16.msra.mxu1 %v2706_v29 }
 0x55f   : > { %2626 = vmatprep.subr.bf16.mxu1 %v2795_v9 }
 0x562   : > { %2627 = vmatpush3.bf16.msra.mxu1 %v2707_v30 }
 0x563   : > { %2628 = vmatprep.subr.bf16.mxu1 %v2795_v9 }
 0x566   : > { %2629 = vmatpush3.bf16.msra.mxu1 %v2708_v31 }
 0x610   : > { %v1830_v45 = vpop.f32.mrb[44].mxu0 }
 0x611   : > { %v2586_v46 = vpop.f32.mrb[45].mxu0  ;;  %v1974_v49 = vsel %vm548_vm0, %v1830_v45, 0.0  ;;  %v2353_v45 = vld [vmem:[%s3360_s16] ss:$0 sm:$0xff] }
 0x612   : > { %v1833_v47 = vpop.f32.mrb[46].mxu0 }
 0x613   : > { %v2587_v48 = vpop.f32.mrb[47].mxu0 }
 0x614   : > { %v1876_v42 = vpop.f32.mrb[36].mxu1 }
 0x615   : > { %v1975_v50 = vsel %vm548_vm0, %v1876_v42, 0.0  ;;  %v2592_v51 = vpop.f32.mrb[37].mxu1 }
 0x616   : > { %v1976_v52 = vadd.f32 %v1975_v50, %v1974_v49  ;;  %v1879_v53 = vpop.f32.mrb[38].mxu1 }
 0x617   : > { %v2593_v54 = vpop.f32.mrb[39].mxu1 }
 0x619   : > { %v1922_v55 = vpop.f32.mrb[48].mxu0 }
 0x61a   : > { %v1977_v56 = vsel %vm548_vm0, %v1922_v55, 0.0  ;;  %v2598_v57 = vpop.f32.mrb[49].mxu0 }
 0x61b   : > { %v1978_v58 = vadd.f32 %v1977_v56, %v1976_v52  ;;  %v1925_v59 = vpop.f32.mrb[50].mxu0 }
 0x61c   : > { %v2599_v61 = vpop.f32.mrb[51].mxu0  ;;  %v1968_v62 = vpop.f32.mrb[40].mxu1 }
 0x61d   : > { %v1979_v63 = vsel %vm548_vm0, %v1968_v62, 0.0  ;;  %v2604_v1 = vpop.f32.mrb[41].mxu1 }
 0x61e   : > { %v1980_v2 = vadd.f32 %v1979_v63, %v1978_v58  ;;  %v1971_v3 = vpop.f32.mrb[42].mxu1 }
 0x61f   : > { %v2605_v4 = vpop.f32.mrb[43].mxu1 }
 0x620   : > { %v1981_v6 = vadd.f32 %v1980_v2, %v2941_v0  ;;  %v2700_v0 = vld [vmem:[%s3357_s13 + $0x8] sm:$0xff]  }
 0x621   : > { %2609 = vmatpush3.bf16.msra.mxu0 %v2700_v0 }
 0x622   : > { %v3238_v7 = vadd.f32 %v2346_v5, %v1981_v6 }
 0x624   : > { %v1992_v60 = vsel %vm548_vm0, %v3238_v7, 0.0 }
 0x625   : > { %1993 = vadd.xlane.f32.xlu0 %v1992_v60 }
 0x6b2   : > { %v1994_v8 = vpop.xlane.xlu0 %1993 }
 0x6b3   : > { %v1995_v10 = vmul.f32 0.03125, %v1994_v8 }
 0x6b5   : > { %v1996_v38 = vsub.f32 %v3238_v7, %v1995_v10 }
 0x6b7   : > { %v1997_v11 = vmul.f32 %v1996_v38, %v1996_v38 }
 0x6b9   : > { %v1998_v12 = vsel %vm548_vm0, %v1997_v11, 0.0 }
 0x6ba   : > { %1999 = vadd.xlane.f32.xlu1 %v1998_v12 }
 0x747   : > { %v2000_v17 = vpop.xlane.xlu1 %1999 }
 0x748   : > { %v2001_v18 = vmul.f32 0.03125, %v2000_v17 }
 0x74a   : > { %v2002_v19 = vadd.f32 1e-05, %v2001_v18 }
 0x74c   : > { %2727 = vrsqrt.f32 %v2002_v19 }
 0x756   : > { %v2728_v20 = vpop.eup %2727 }
 0x757   : > { %v2004_v22 = vmul.f32 %v2728_v20, %v1996_v38 }
 0x759   : > { %v2011_v24 = vmul.f32 %v2347_v21, %v2004_v22 }
 0x75b   : > { %v2018_v25 = vadd.f32 %v2348_v23, %v2011_v24 }
 0x75d   : > { %v2019_v26 = vpack.c.bf16 %v2018_v25, %v2018_v25 }
 0x75f   : > { %2611 = vmatmul.mubr.msk.bf16.vlgmr.msra.gmra.mrb[52].mxu0 %vm548_vm0, %v2019_v26 }
 0x832   : > { %v2080_v33 = vpop.f32.mrb[52].mxu0 }
 0x833   : > { %v2081_v34 = vadd.f32 %v2349_v32, %v2080_v33  ;;  %v2612_v35 = vpop.f32.mrb[53].mxu0 }
 0x834   : > { %v2083_v36 = vpop.f32.mrb[54].mxu0 }
 0x835   : > { %v2087_v37 = vmul.f32 0.70710677, %v2081_v34  ;;  %v2613_v39 = vpop.f32.mrb[55].mxu0  ;;  %v2086_v9 = vmul.f32 0.5, %v2081_v34 }
 0x837   : > { %2729 = verf.f32 %v2087_v37 }
 0x841   : > { %v2730_v40 = vpop.eup %2729 }
 0x842   : > { %v2089_v41 = vadd.f32 1.0, %v2730_v40 }
 0x844   : > { %v2090_v43 = vmul.f32 %v2089_v41, %v2086_v9 }
 0x846   : > { %v2091_v44 = vpack.c.bf16 %v2090_v43, %v2090_v43 }
 0x848   : > { %2631 = vmatmul.mubr.bf16.vlgmr.msra.gmra.mrb[44].mxu1 %v2091_v44 }
 0x91b   : > { %v2197_v46 = vpop.f32.mrb[44].mxu1 }
 0x91c   : > { %v2198_v47 = vadd.f32 %v2353_v45, %v2197_v46  ;;  %v2632_v48 = vpop.f32.mrb[45].mxu1 }
 0x91d   : > { %v2200_v42 = vpop.f32.mrb[46].mxu1 }
 0x91e   : > { %v2203_v49 = vadd.f32 %v2198_v47, %v3238_v7  ;;  %v2633_v50 = vpop.f32.mrb[47].mxu1 }
 0x920   : > { %2204 = vst.msk [vmem:[%s539_s22] sm:$0xff] %vm548_vm0, %v2203_v49 }
 0x921   : > { %2744 = shalt.err (!%p2741_p3)
}
 0x922   : > { %s2745_s30 = scalar_lea.hbm %s3301_s2, 128  ;;  %s2749_s26 = scalar_lea.hbm %s3361_s17, 256 }
 0x923   : > { %p2746_p4 = scmp.ne.s32.totalorder %s3301_s2, %s2745_s30  ;;  %p2750_p9 = scmp.lt.u32.totalorder %s3301_s2, %s3361_s17 }
 0x924   : > { %p2751_p10 = scmp.lt.u32.totalorder %s2749_s26, %s2745_s30  ;;  %p2753_p12 = scmp.lt.u32.totalorder %s2745_s30, %s3301_s2 }
 0x925   : > { %p2747_p7 = pnand %p2746_p4, %p2926_p5 }
 0x926   : > { %p2752_p11 = por %p2751_p10, %p2750_p9 }
 0x927   : > { %p2748_p8 = pneg %p2747_p7 }
 0x928   : > { %p2754_p13 = por %p2753_p12, %p2752_p11 }
 0x92a   : > { %p2755_p0 = pnand %p2754_p13, %p2748_p8 }
 0x92c   : > { %2758 = shalt.err (!%p2755_p0)
}
 0x92d   : > { %2634 = dma.vmem_to_hbm [thread:$0]  (%p2926_p5), %s3303_s29, 128, %s3301_s2, %s2206_s28  }
 0x92e PF: > { %p2640_p1 = scmp.ge.s32.totalorder %s2793_s27, 2  ;;  %s2231_s3 = sand.u32 1, %s2781_s24  }
 0x92f   : > { %s2232_s19 = scalar_lea.sflag [#allocation3], %s2231_s3 }
 0x930   : > { %p2637_p2 = pnand %p2640_p1, %p2930_p6 }
 0x932   : > { %2776 = dma.done.wait (!%p2637_p2), %s2232_s19, 128  }
 0x933   : > { %2778 = vsyncadd (!%p2637_p2), %s2232_s19, 4294967168  ;;  %s3378_s27 = sld [smem:[#allocation6_spill]]  ;;  %s3379_s21 = sld [smem:[#allocation5_spill]] }
 0x934   : > { %s3380_s26 = sld [smem:[#allocation7_spill]]  ;;  %s3381_s24 = smov %s2785_s25 }
 0x939   : > { %p27_p3 = scmp.ge.s32.totalorder %s3378_s27, 4   ;;  %s3382_s25 = smov %s3379_s21 }
 0x93b   :  { %29 = sbr.rel (!%p27_p3) target bundleno = 8 (0x8), region = 123 }
 0x942   :  { %2237 = vsyncpa [#allocation3], 1 }
 0x943   :  { %2239 = vsyncpa [#allocation3 + $0x1], 1 }

</bundles_post_ra>
